<compile_context>
chip_gen: v7x
topology: tpu7x:2x2x1
jax: 0.10.0
libtpu: 0.0.40
codegen_flags: <defaults>
</compile_context>

<pallas_src>
import jax
import jax.numpy as jnp
import numpy as np
from jax.experimental import pallas as pl
from jax.experimental.pallas import tpu as pltpu

# ----------------------------------------------------------------------------
# Static GP expression (DEAP-style prefix list of (name, arity)) and adjacency
# list mapping node index -> list of consumer (parent-operator) node indices.
# Tree: mul(-1, mul(ARG0, log(ARG1)))  ~  -y * log(softmax(pred))   (x-entropy)
# ----------------------------------------------------------------------------
EXPRESSION_TREE = (
    ('mul', 2),   # 0  root
    ('-1', 0),    # 1  constant terminal
    ('mul', 2),   # 2
    ('ARG0', 0),  # 3  y_target
    ('log', 1),   # 4
    ('ARG1', 0),  # 5  y_pred
)
ADJACENCY_LIST = {0: [], 1: [0], 2: [0], 3: [2], 4: [2], 5: [4]}

# ----------------------------------------------------------------------------
# Plain (un-folded) DAG evaluation — exact mirror of the PyTorch traversal.
# Used by the pure-JAX reference.
# ----------------------------------------------------------------------------
_OPS = {
    'add': lambda a, b: a + b,
    'sub': lambda a, b: a - b,
    'mul': lambda a, b: a * b,
    'div': lambda a, b: a / b,
    'log': jnp.log,
    'square': lambda a: a * a,
    'abs': jnp.abs,
}


def _evaluate_dag_ref(y_pred, y_target, get_param):
    results = {}
    for key, values in reversed(list(ADJACENCY_LIST.items())):
        name, _ = EXPRESSION_TREE[key]
        if name == 'ARG0':
            results[key] = y_target
        elif name == 'ARG1':
            results[key] = y_pred
        elif name == '1':
            results[key] = jnp.float32(1.0)
        elif name == '-1':
            results[key] = jnp.float32(-1.0)
        for value in values:
            cname, carity = EXPRESSION_TREE[value]
            scaled = results[key] * get_param(key)
            if carity == 2:
                if value not in results:
                    results[value] = scaled
                else:
                    results[value] = _OPS[cname](scaled, results[value])
            elif carity == 1:
                results[value] = _OPS[cname](scaled)
    return results[0]  # output_activation = Identity


# ----------------------------------------------------------------------------
# Folded DAG evaluation (kernel path).
#   * Scalar edge-parameter chains are deferred (one scalar multiply at the end).
#   * ARG1 (softmax probs) and ARG0 (one-hot) are symbolic until actually needed:
#       log(ARG1 * params)   -> log_softmax + sum(log(params))   (EUP log pass saved)
#       one_hot * X          -> where(class_iota == labels, X, 0) (one-hot never built)
# Semantics are identical to the plain traversal above.
# ----------------------------------------------------------------------------
class _Coeff:
    """Deferred scalar multiplier: const * prod(params[k] for k in keys)."""
    __slots__ = ("const", "keys")

    def __init__(self, const=1.0, keys=()):
        self.const = float(const)
        self.keys = tuple(keys)

    def mul_param(self, key):
        return _Coeff(self.const, self.keys + (key,))

    def mul(self, other):
        return _Coeff(self.const * other.const, self.keys + other.keys)

    def is_one(self):
        return self.const == 1.0 and not self.keys

    def value(self, params_ref):
        v = self.const
        for k in self.keys:
            v = v * params_ref[k]
        return v

    def log_value(self, log_params_ref):
        # Only called when const == 1.0 (see _fold_log). None -> identity.
        s = None
        for k in self.keys:
            s = log_params_ref[k] if s is None else s + log_params_ref[k]
        return s


_ONE = _Coeff()


class _Ctx:
    """Lazy providers for the transformed inputs inside one (C, tile) block."""

    def __init__(self, logits_f32, labels_row):
        self._x = logits_f32          # (C, T) f32
        self._labels = labels_row     # (1, T) i32
        self.shape = logits_f32.shape
        self._logp = None
        self._p = None
        self._mask = None

    def log_probs(self):
        if self._logp is None:
            z = self._x - jnp.max(self._x, axis=0, keepdims=True)
            # log-softmax: one vector exp pass + a (1, T) log of the denominator.
            self._logp = z - jnp.log(jnp.sum(jnp.exp(z), axis=0, keepdims=True))
        return self._logp

    def probs(self):
        if self._p is None:
            self._p = jnp.exp(self.log_probs())
        return self._p

    def onehot_mask(self):
        if self._mask is None:
            classes = jax.lax.broadcasted_iota(jnp.int32, self.shape, 0)
            self._mask = classes == self._labels
        return self._mask

    def onehot_f32(self):
        return self.onehot_mask().astype(jnp.float32)


class _Val:
    """coeff * base, where base is symbolic ('pred'/'onehot'/'scalar') or concrete."""
    __slots__ = ("coeff", "kind", "tensor")

    def __init__(self, coeff, kind, tensor=None):
        self.coeff = coeff
        self.kind = kind          # 'scalar' | 'pred' | 'onehot' | 'tensor'
        self.tensor = tensor

    def scale(self, key):
        return _Val(self.coeff.mul_param(key), self.kind, self.tensor)

    def base(self, ctx):
        if self.kind == 'pred':
            return ctx.probs()
        if self.kind == 'onehot':
            return ctx.onehot_f32()
        if self.kind == 'tensor':
            return self.tensor
        return jnp.ones(ctx.shape, jnp.float32)   # 'scalar' (value carried in coeff)

    def materialize(self, ctx, params_ref):
        v = self.coeff.value(params_ref)
        if self.kind == 'scalar':
            return v
        b = self.base(ctx)
        if isinstance(v, float) and v == 1.0:
            return b
        return v * b


def _fold_mul(a, b, ctx, params_ref, log_params_ref):
    coeff = a.coeff.mul(b.coeff)
    if a.kind == 'scalar':
        return _Val(coeff, b.kind, b.tensor)
    if b.kind == 'scalar':
        return _Val(coeff, a.kind, a.tensor)
    if a.kind == 'onehot' or b.kind == 'onehot':
        other = b if a.kind == 'onehot' else a
        if other.kind == 'onehot':
            return _Val(coeff, 'onehot')
        # one_hot * X  ->  select, no f32 one-hot tensor materialized
        return _Val(coeff, 'tensor',
                    jnp.where(ctx.onehot_mask(), other.base(ctx), 0.0))
    return _Val(coeff, 'tensor', a.base(ctx) * b.base(ctx))


def _fold_add(a, b, ctx, params_ref, log_params_ref):
    return _Val(_ONE, 'tensor', a.materialize(ctx, params_ref) + b.materialize(ctx, params_ref))


def _fold_sub(a, b, ctx, params_ref, log_params_ref):
    return _Val(_ONE, 'tensor', a.materialize(ctx, params_ref) - b.materialize(ctx, params_ref))


def _fold_div(a, b, ctx, params_ref, log_params_ref):
    return _Val(_ONE, 'tensor', a.materialize(ctx, params_ref) / b.materialize(ctx, params_ref))


def _fold_log(a, ctx, params_ref, log_params_ref):
    # Fused path: log(prod(params) * softmax(x)) = log_softmax(x) + sum(log(params)).
    if a.kind == 'pred' and a.coeff.const == 1.0:
        lp = ctx.log_probs()
        lc = a.coeff.log_value(log_params_ref)
        return _Val(_ONE, 'tensor', lp if lc is None else lp + lc)
    return _Val(_ONE, 'tensor', jnp.log(a.materialize(ctx, params_ref)))


def _fold_square(a, ctx, params_ref, log_params_ref):
    m = a.materialize(ctx, params_ref)
    return _Val(_ONE, 'tensor', m * m)


def _fold_abs(a, ctx, params_ref, log_params_ref):
    return _Val(_ONE, 'tensor', jnp.abs(a.materialize(ctx, params_ref)))


_FOLD_BIN = {'mul': _fold_mul, 'add': _fold_add, 'sub': _fold_sub, 'div': _fold_div}
_FOLD_UN = {'log': _fold_log, 'square': _fold_square, 'abs': _fold_abs}


def _evaluate_dag_folded(ctx, params_ref, log_params_ref):
    results = {}
    for key, values in reversed(list(ADJACENCY_LIST.items())):
        name, _ = EXPRESSION_TREE[key]
        if name == 'ARG0':
            results[key] = _Val(_ONE, 'onehot')
        elif name == 'ARG1':
            results[key] = _Val(_ONE, 'pred')
        elif name == '1':
            results[key] = _Val(_Coeff(1.0), 'scalar')
        elif name == '-1':
            results[key] = _Val(_Coeff(-1.0), 'scalar')
        for value in values:
            cname, carity = EXPRESSION_TREE[value]
            scaled = results[key].scale(key)
            if carity == 2:
                if value not in results:
                    results[value] = scaled
                else:
                    results[value] = _FOLD_BIN[cname](scaled, results[value],
                                                      ctx, params_ref, log_params_ref)
            elif carity == 1:
                results[value] = _FOLD_UN[cname](scaled, ctx, params_ref, log_params_ref)
    return results[0]  # output_activation = Identity


# ----------------------------------------------------------------------------
# Pallas kernel: one batch tile. Blocks are (C, tile): class on sublanes, batch
# on lanes; labels are a lane-dense (1, tile) int32 row; output is the
# per-example loss row (1, tile). Partial last blocks need no masking: garbage
# input columns only affect out-of-bounds output lanes, which Pallas discards.
# ----------------------------------------------------------------------------
def gp_tree_kernel(params_ref, log_params_ref, logits_ref, labels_ref, out_ref):
    logits = logits_ref[...].astype(jnp.float32)       # upcast after the (possibly bf16) load
    ctx = _Ctx(logits, labels_ref[...])

    root = _evaluate_dag_folded(ctx, params_ref, log_params_ref)

    # output_dim > 1: sum over the class (sublane) axis, then apply the deferred
    # scalar edge-parameter coefficient once to the (1, tile) row.
    per_example = jnp.sum(root.base(ctx), axis=0, keepdims=True)
    if root.coeff.is_one():
        out_ref[...] = per_example
    else:
        out_ref[...] = per_example * root.coeff.value(params_ref)


# ----------------------------------------------------------------------------
# Wrapper: layout, tiling and VMEM budget.
# ----------------------------------------------------------------------------
def _round_up(x, m):
    return ((x + m - 1) // m) * m


def _vmem_limit_bytes():
    cap = 128 * 1024 * 1024
    try:
        cap = int(pltpu.get_tpu_info().vmem_capacity_bytes)   # 64 MiB on v7x, 128 MiB v5e/v6e
    except Exception:
        pass
    return max(16 * 1024 * 1024, min(int(0.70 * cap), 96 * 1024 * 1024))


def _choose_tile(n, c, itemsize, vmem_limit, target_block_bytes=2 * 1024 * 1024):
    """Pick a batch tile giving ~2 MiB logits blocks, capped by the VMEM budget."""
    sublane = 8 * max(1, 4 // itemsize)                 # sublane packing of the input dtype
    c_pad_in = _round_up(max(c, 1), sublane)
    tile = target_block_bytes // max(1, c_pad_in * itemsize)
    # Per-step working set: double-buffered input block + ~5 live f32 (C, tile)
    # intermediates (upcast logits, z, exp, log_p, select) + small (1, tile) rows.
    per_col = c_pad_in * itemsize * 2 + _round_up(max(c, 1), 8) * 4 * 5 + 4 * 4
    tile = min(tile, int(0.6 * vmem_limit) // per_col)
    tile = max(128, (tile // 128) * 128)
    tile = min(tile, max(128, (n // 128) * 128))        # avoid blocks (much) larger than N
    return int(tile)


def gp_tree_loss(params, logits, labels, *, reduction='mean', tile_n=None,
                 class_major=False):
    """GeneticProgrammingTree.forward for the output_dim > 1 branch.

    class_major=True : `logits` is (C, N) class-major — the fast path (no HBM
                       transpose). Produce this layout upstream (e.g. swap the
                       operands of the preceding classifier matmul).
    class_major=False: `logits` is (N, C) as in the PyTorch forward; a one-time
                       transpose pass is performed here (extra HBM read+write).
    """
    if class_major:
        logits_cn = logits
    else:
        logits_cn = jnp.transpose(logits)   # fallback layout plumbing; avoid in production
    c, n = logits_cn.shape
    labels_row = labels.reshape(1, n).astype(jnp.int32)     # free reshape, lane-dense

    itemsize = int(jnp.dtype(logits_cn.dtype).itemsize)
    vmem_limit = _vmem_limit_bytes()
    tile = tile_n if tile_n is not None else _choose_tile(n, c, itemsize, vmem_limit)
    tile = max(128, _round_up(int(tile), 128))
    grid = pl.cdiv(n, tile)                 # partial last block handled without jnp.pad

    params_f32 = params.astype(jnp.float32)
    log_params = jnp.log(params_f32)        # tiny; enables in-kernel log-softmax fusion

    cost = pl.CostEstimate(
        flops=8 * n * c,
        transcendentals=n * c + n,          # one exp per element + (1, N) log of the denom
        bytes_accessed=n * c * itemsize + 2 * n * 4 + 8 * int(params_f32.size),
    )

    per_example = pl.pallas_call(
        gp_tree_kernel,
        out_shape=jax.ShapeDtypeStruct((1, n), jnp.float32),
        grid_spec=pltpu.PrefetchScalarGridSpec(
            num_scalar_prefetch=2,                            # params + log(params) in SMEM
            grid=(grid,),
            in_specs=[
                pl.BlockSpec((c, tile), lambda i, p, lp: (0, i)),   # logits (C, N)
                pl.BlockSpec((1, tile), lambda i, p, lp: (0, i)),   # labels (1, N)
            ],
            out_specs=pl.BlockSpec((1, tile), lambda i, p, lp: (0, i)),
        ),
        compiler_params=pltpu.CompilerParams(
            dimension_semantics=("parallel",),   # batch tiles independent
            vmem_limit_bytes=vmem_limit,
        ),
        cost_estimate=cost,
    )(params_f32, log_params, logits_cn, labels_row)

    per_example = per_example[0]
    if reduction == 'mean':
        return jnp.mean(per_example)
    elif reduction == 'sum':
        return jnp.sum(per_example)
    return per_example


# ----------------------------------------------------------------------------
# Pure-JAX reference (semantics of the PyTorch forward) for verification.
# ----------------------------------------------------------------------------
def gp_tree_loss_ref(params, logits, labels, reduction='mean'):
    y_pred = jax.nn.softmax(logits.astype(jnp.float32), axis=1)
    y_target = jax.nn.one_hot(labels, logits.shape[1], dtype=jnp.float32)
    p32 = params.astype(jnp.float32)
    loss_elem = _evaluate_dag_ref(y_pred, y_target, lambda k: p32[k])
    per_example = jnp.sum(loss_elem, axis=1)
    if reduction == 'mean':
        return jnp.mean(per_example)
    elif reduction == 'sum':
        return jnp.sum(per_example)
    return per_example


if __name__ == "__main__":
    key = jax.random.PRNGKey(0)
    k_param, k_logits, k_labels = jax.random.split(key, 3)

    num_nodes = len(EXPRESSION_TREE)
    output_dim = 8
    batch = 256

    # parameterize=True in __init__: param_i = randn(1) * 0.001 + 1 (deterministic here)
    params = jax.random.normal(k_param, (num_nodes,), jnp.float32) * 0.001 + 1.0
    logits = jax.random.normal(k_logits, (batch, output_dim), jnp.float32)
    labels = jax.random.randint(k_labels, (batch,), 0, output_dim, jnp.int32)

    # Default adaptive tile, (N, C) compatibility path (single block, divides evenly).
    out = jax.block_until_ready(gp_tree_loss(params, logits, labels))
    ref = jax.block_until_ready(gp_tree_loss_ref(params, logits, labels))
    np.testing.assert_allclose(np.asarray(out), np.asarray(ref), rtol=2e-4, atol=2e-4)

    # Multi-tile grid + un-padded partial last block, class-major fast path
    # (N=300, tile=128 -> 3 tiles, last block has 44 valid columns).
    batch2 = 300
    logits2 = jax.random.normal(jax.random.PRNGKey(1), (batch2, output_dim), jnp.float32)
    labels2 = jax.random.randint(jax.random.PRNGKey(2), (batch2,), 0, output_dim, jnp.int32)
    out2 = jax.block_until_ready(
        gp_tree_loss(params, logits2.T, labels2, tile_n=128, class_major=True))
    ref2 = jax.block_until_ready(gp_tree_loss_ref(params, logits2, labels2))
    np.testing.assert_allclose(np.asarray(out2), np.asarray(ref2), rtol=2e-4, atol=2e-4)

    print("KERNEL_OK")
</pallas_src>

<mosaic_0001>
module attributes {stable_mosaic.version = 11 : i64} {
  func.func @gp_tree_kernel(%arg0: i32, %arg1: memref<6xf32, #tpu.memory_space<smem>>, %arg2: memref<6xf32, #tpu.memory_space<smem>>, %arg3: memref<8x256xf32, #tpu.memory_space<vmem>>, %arg4: memref<1x256xi32, #tpu.memory_space<vmem>>, %arg5: memref<1x256xf32, #tpu.memory_space<vmem>>) attributes {dimension_semantics = [#tpu.dimension_semantics<parallel>], iteration_bounds = array<i64: 1>, scalar_prefetch = 2 : i64, scratch_operands = 0 : i64, tpu.core_type = #tpu.core_type<tc>, window_params = [{transform_indices = @transform_0, window_bounds = array<i64: 8, 256>}, {transform_indices = @transform_1, window_bounds = array<i64: 1, 256>}, {transform_indices = @transform_2, window_bounds = array<i64: 1, 256>}]} {
    %c0 = arith.constant 0 : index
    %c0_0 = arith.constant 0 : index
    %0 = vector.load %arg3[%c0, %c0_0] : memref<8x256xf32, #tpu.memory_space<vmem>>, vector<8x256xf32>
    %c0_1 = arith.constant 0 : index
    %c0_2 = arith.constant 0 : index
    %1 = vector.load %arg4[%c0_1, %c0_2] : memref<1x256xi32, #tpu.memory_space<vmem>>, vector<1x256xi32>
    %cst = arith.constant dense<0xFF800000> : vector<256xf32>
    %2 = vector.multi_reduction <maximumf>, %0, %cst [0] : vector<8x256xf32> to vector<256xf32>
    %3 = vector.shape_cast %2 : vector<256xf32> to vector<1x256xf32>
    %4 = vector.broadcast %3 : vector<1x256xf32> to vector<8x256xf32>
    %5 = arith.subf %0, %4 : vector<8x256xf32>
    %6 = math.exp %5 : vector<8x256xf32>
    %cst_3 = arith.constant dense<0.000000e+00> : vector<256xf32>
    %7 = vector.multi_reduction <add>, %6, %cst_3 [0] : vector<8x256xf32> to vector<256xf32>
    %8 = vector.shape_cast %7 : vector<256xf32> to vector<1x256xf32>
    %9 = math.log %8 : vector<1x256xf32>
    %10 = vector.broadcast %9 : vector<1x256xf32> to vector<8x256xf32>
    %11 = arith.subf %5, %10 : vector<8x256xf32>
    %c5 = arith.constant 5 : index
    %12 = memref.load %arg2[%c5] : memref<6xf32, #tpu.memory_space<smem>>
    %13 = vector.broadcast %12 : f32 to vector<8x256xf32>
    %14 = arith.addf %11, %13 : vector<8x256xf32>
    %15 = tpu.iota {dimensions = array<i32: 0>} : vector<8x256xi32>
    %16 = vector.broadcast %1 : vector<1x256xi32> to vector<8x256xi32>
    %17 = arith.cmpi eq, %15, %16 : vector<8x256xi32>
    %cst_4 = arith.constant 0.000000e+00 : f32
    %18 = vector.broadcast %cst_4 : f32 to vector<8x256xf32>
    %19 = arith.select %17, %14, %18 : vector<8x256xi1>, vector<8x256xf32>
    %cst_5 = arith.constant dense<0.000000e+00> : vector<256xf32>
    %20 = vector.multi_reduction <add>, %19, %cst_5 [0] : vector<8x256xf32> to vector<256xf32>
    %21 = vector.shape_cast %20 : vector<256xf32> to vector<1x256xf32>
    %c1 = arith.constant 1 : index
    %22 = memref.load %arg1[%c1] : memref<6xf32, #tpu.memory_space<smem>>
    %cst_6 = arith.constant -1.000000e+00 : f32
    %23 = arith.mulf %cst_6, %22 : f32
    %c3 = arith.constant 3 : index
    %24 = memref.load %arg1[%c3] : memref<6xf32, #tpu.memory_space<smem>>
    %25 = arith.mulf %23, %24 : f32
    %c4 = arith.constant 4 : index
    %26 = memref.load %arg1[%c4] : memref<6xf32, #tpu.memory_space<smem>>
    %27 = arith.mulf %25, %26 : f32
    %c2 = arith.constant 2 : index
    %28 = memref.load %arg1[%c2] : memref<6xf32, #tpu.memory_space<smem>>
    %29 = arith.mulf %27, %28 : f32
    %30 = vector.broadcast %29 : f32 to vector<1x256xf32>
    %31 = arith.mulf %21, %30 : vector<1x256xf32>
    %c0_7 = arith.constant 0 : index
    %c0_8 = arith.constant 0 : index
    %32 = vector.load %arg5[%c0_7, %c0_8] : memref<1x256xf32, #tpu.memory_space<vmem>>, vector<1x256xf32>
    tpu.vector_store %arg5[%c0_7, %c0_8], %31 {strides = array<i32>} : memref<1x256xf32, #tpu.memory_space<vmem>>, vector<1x256xf32>,
    return
  }
  func.func @transform_0(%arg0: i32, %arg1: memref<6xf32, #tpu.memory_space<smem>>, %arg2: memref<6xf32, #tpu.memory_space<smem>>) -> (i32, i32) {
    %c0_i32 = arith.constant 0 : i32
    %c0_i32_0 = arith.constant 0 : i32
    return %c0_i32, %arg0 : i32, i32
  }
  func.func @transform_1(%arg0: i32, %arg1: memref<6xf32, #tpu.memory_space<smem>>, %arg2: memref<6xf32, #tpu.memory_space<smem>>) -> (i32, i32) {
    %c0_i32 = arith.constant 0 : i32
    %c0_i32_0 = arith.constant 0 : i32
    return %c0_i32, %arg0 : i32, i32
  }
  func.func @transform_2(%arg0: i32, %arg1: memref<6xf32, #tpu.memory_space<smem>>, %arg2: memref<6xf32, #tpu.memory_space<smem>>) -> (i32, i32) {
    %c0_i32 = arith.constant 0 : i32
    %c0_i32_0 = arith.constant 0 : i32
    return %c0_i32, %arg0 : i32, i32
  }
}

</mosaic_0001>

<bundles_post_ra>
// kernel: tpu_custom_call.1
= control target key start
LH: loop header
LB: loop body
LE: loop exit
PB: predicated region body
PF: predicated region fallthrough
CT: control target
= control target key end

     0   :  { %s367_s0 = inlined_call_operand.hbm [shape: f32[6], index: 0, kind: input, shape index: {}]   ;;  %s368_s2 = inlined_call_operand.hbm [shape: f32[8,256], index: 2, kind: input, shape index: {}]   ;;  %s369_s3 = inlined_call_operand.hbm [shape: s32[1,256], index: 3, kind: input, shape index: {}]   ;;  %s370_s4 = inlined_call_operand.hbm [shape: f32[1,256], index: 4, kind: output, shape index: {}]   ;;  %s371_s1 = inlined_call_operand.hbm [shape: f32[6], index: 1, kind: input, shape index: {}]  }
   0x1   :  { %s182_s17 = scalar_lea.hbm %s367_s0, 16 }
   0x2   :  { %p183_p0 = scmp.ne.s32.totalorder %s367_s0, %s182_s17  ;;  %p186_p1 = scmp.lt.u32.totalorder %s182_s17, %s367_s0 }
   0x4   :  { %p188_p2 = pnand %p186_p1, %p183_p0 }
   0x6   :  { %191 = shalt.err (!%p188_p2)  }
   0x7   :  { %s276_s22 = smov [#allocation3]   ;;  %s192_s27 = scalar_lea.hbm %s371_s1, 16 }
   0x8   :  { %10 = dma.hbm_to_smem %s367_s0, 16, %s276_s22, [#allocation2] }
   0x9   :  { %p193_p3 = scmp.ne.s32.totalorder %s371_s1, %s192_s27  ;;  %p196_p4 = scmp.lt.u32.totalorder %s192_s27, %s371_s1 }
   0xb   :  { %p198_p5 = pnand %p196_p4, %p193_p3 }
   0xd   :  { %201 = shalt.err (!%p198_p5)  }
   0xe   :  { %s277_s6 = smov [#allocation4]  }
   0xf   :  { %12 = dma.hbm_to_smem %s371_s1, 16, %s277_s6, [#allocation2] }
  0x10   :  { %268 = dma.done.wait [#allocation2], 32 }
  0x11   :  { %269 = vsyncadd [#allocation2], 4294967264 }
  0x12   :  { %14 = sfence }
  0x13   :  { %15 = vsyncpa [#allocation6], 0 }
  0x14   :  { %16 = vsyncpa [#allocation9], 0 }
  0x15   :  { %17 = vsyncpa [#allocation7], 0  ;;  %s278_s0 = smov [#allocation5]   ;;  %s279_s10 = smov [#allocation8]  }
  0x16   :  { %s24_s9 = sshll.u32 %s278_s0, 4  ;;  %s34_s11 = sshll.u32 %s279_s10, 4  ;;  %s25_s9 = int_to_ptr.vmem [resolvable:$true] %s24_s9  ;;  %s35_s11 = int_to_ptr.vmem [resolvable:$true] %s34_s11 }
  0x17   :  { %s202_s14 = scalar_lea.hbm %s368_s2, 256 }
  0x18   :  { %p203_p6 = scmp.ne.s32.totalorder %s368_s2, %s202_s14  ;;  %p206_p7 = scmp.lt.u32.totalorder %s202_s14, %s368_s2 }
  0x1a   :  { %p208_p8 = pnand %p206_p7, %p203_p6 }
  0x1c   :  { %211 = shalt.err (!%p208_p8)
}
  0x1d   :  { %s212_s18 = scalar_lea.vmem %s25_s9, 256  ;;  %p217_p10 = scmp.lt.s32.totalorder %s25_s9, %s25_s9 }
  0x1e   :  { %p213_p9 = scmp.ne.s32.totalorder %s25_s9, %s212_s18  ;;  %p218_p11 = scmp.lt.s32.totalorder %s212_s18, %s212_s18 }
  0x20   :  { %p219_p12 = por %p218_p11, %p217_p10 }
  0x22   :  { %p220_p13 = pnand %p219_p12, %p213_p9 }
  0x24   :  { %223 = shalt.err (!%p220_p13)
}
  0x25   :  { %27 = dma.hbm_to_vmem [thread:$0]  %s368_s2, 256, %s25_s9, [#allocation6]  }
  0x26   :  { %s224_s23 = scalar_lea.hbm %s369_s3, 32 }
  0x27   :  { %p225_p0 = scmp.ne.s32.totalorder %s369_s3, %s224_s23  ;;  %p228_p1 = scmp.lt.u32.totalorder %s224_s23, %s369_s3 }
  0x29   :  { %p230_p2 = pnand %p228_p1, %p225_p0 }
  0x2b   :  { %233 = shalt.err (!%p230_p2)
}
  0x2c   :  { %s234_s28 = scalar_lea.vmem %s35_s11, 32  ;;  %p239_p4 = scmp.lt.s32.totalorder %s35_s11, %s35_s11 }
  0x2d   :  { %p235_p3 = scmp.ne.s32.totalorder %s35_s11, %s234_s28  ;;  %p240_p5 = scmp.lt.s32.totalorder %s234_s28, %s234_s28 }
  0x2f   :  { %p241_p6 = por %p240_p5, %p239_p4 }
  0x31   :  { %p242_p7 = pnand %p241_p6, %p235_p3 }
  0x33   :  { %245 = shalt.err (!%p242_p7)
}
  0x34   :  { %37 = dma.hbm_to_vmem [thread:$0]  %s369_s3, 32, %s35_s11, [#allocation9]  }
  0x35   :  { %270 = dma.done.wait [#allocation6], 256  }
  0x36   :  { %271 = vsyncadd [#allocation6], 4294967040 }
  0x37   :  { %272 = dma.done.wait [#allocation9], 32  }
  0x38   :  { %273 = vsyncadd [#allocation9], 4294967264  ;;  %v44_v0 = vld [vmem:[#allocation5] sm:$0xff]  ;;  %v45_v1 = vld [vmem:[#allocation5 + $0x8] sm:$0xff]  ;;  %v87_v31 = vlaneseq  ;;  %s164_s3 = sld [smem:[#allocation3 + $0x1]]  ;;  %s163_s30 = sld [smem:[#allocation4 + $0x5]] }
  0x39   :  { %v47_v2 = vrot.slane %v44_v0, 4  ;;  %v53_v3 = vrot.slane %v45_v1, 4  ;;  %v46_v35 = vld [vmem:[#allocation8] sm:$0x3]  ;;  %s165_s5 = sld [smem:[#allocation3 + $0x3]]  ;;  %s166_s7 = sld [smem:[#allocation3 + $0x4]] }
  0x3a   :  { %v88_v33 = vshrl.u32 %v87_v31, 7  ;;  %s167_s0 = sld [smem:[#allocation3 + $0x2]]  ;;  %v280_v56 = vmov 1966171168   ;;  %s281_s11 = smov [#allocation10]   ;;  %vm144_vm2 = vcmp.lt.s32.totalorder %v87_v31, 256 }
  0x3b   :  { %v48_v4 = vmax.f32 %v44_v0, %v47_v2  ;;  %v54_v5 = vmax.f32 %v45_v1, %v53_v3  ;;  %v128_v57 = vunpack.c.l.s4 %v280_v56  ;;  %s153_s12 = sshll.u32 %s281_s11, 4  ;;  %s154_s12 = int_to_ptr.vmem [resolvable:$true] %s153_s12 }
  0x3c   :  { %v91_v34 = vsub.s32 0, %v88_v33  ;;  %v95_v36 = vsub.s32 1, %v88_v33  ;;  %s246_s13 = scalar_lea.vmem %s154_s12, 32  ;;  %p251_p9 = scmp.lt.s32.totalorder %s154_s12, %s154_s12 }
  0x3d   :  { %v49_v6 = vrot.slane %v48_v4, 2  ;;  %v55_v7 = vrot.slane %v54_v5, 2  ;;  %v129_v63 = vunpack.c.0.s8 %v128_v57  ;;  %p247_p8 = scmp.ne.s32.totalorder %s154_s12, %s246_s13  ;;  %p252_p10 = scmp.lt.s32.totalorder %s246_s13, %s246_s13 }
  0x3e   :  { %v92_v38 = vrot.slane %v46_v35, %v91_v34  ;;  %v96_v41 = vrot.slane %v46_v35, %v95_v36  ;;  %s114_s6 = smul.f32 -1.0, %s164_s3  ;;  %v84_v43 = vstv %s163_s30 }
  0x3f   :  { %v50_v8 = vmax.f32 %v48_v4, %v49_v6  ;;  %v56_v9 = vmax.f32 %v54_v5, %v55_v7  ;;  %v132_v4 = vsub.s32 %v129_v63, %v88_v33  ;;  %p253_p11 = por %p252_p10, %p251_p9 }
  0x40   :  { %vm97_vm0 = vcmp.eq.s32.totalorder %v88_v33, %v92_v38  ;;  %vm98_vm1 = vcmp.eq.s32.totalorder %v88_v33, %v96_v41  ;;  %s116_s8 = smul.f32 %s165_s5, %s114_s6 }
  0x41   :  { %v51_v10 = vrot.slane %v50_v8, 1  ;;  %v57_v11 = vrot.slane %v56_v9, 1  ;;  %p254_p12 = pnand %p253_p11, %p247_p8 }
  0x42   :  { %s118_s9 = smul.f32 %s166_s7, %s116_s8 }
  0x43   :  { %v52_v12 = vmax.f32 %v50_v8, %v51_v10  ;;  %v58_v13 = vmax.f32 %v56_v9, %v57_v11 }
  0x44   :  { %s120_s10 = smul.f32 %s167_s0, %s118_s9 }
  0x45   :  { %v59_v14 = vsub.f32 %v44_v0, %v52_v12  ;;  %v60_v15 = vsub.f32 %v45_v1, %v58_v13 }
  0x46   :  { %v121_v62 = vstv %s120_s10 }
  0x47   :  { %v61_v16 = vmul.f32 1.442695, %v59_v14  ;;  %v63_v17 = vmul.f32 1.442695, %v60_v15 }
  0x49   :  { %174 = vpow2.f32 %v61_v16 }
  0x4a   :  { %176 = vpow2.f32 %v63_v17 }
  0x53   :  { %v175_v18 = vpop.eup %174 }
  0x54   :  { %v177_v19 = vpop.eup %176  ;;  %v65_v20 = vrot.slane %v175_v18, 4 }
  0x55   :  { %v71_v21 = vrot.slane %v177_v19, 4 }
  0x56   :  { %v66_v22 = vadd.f32 %v175_v18, %v65_v20 }
  0x57   :  { %v72_v23 = vadd.f32 %v177_v19, %v71_v21 }
  0x58   :  { %v67_v24 = vrot.slane %v66_v22, 2 }
  0x59   :  { %v73_v25 = vrot.slane %v72_v23, 2 }
  0x5a   :  { %v68_v26 = vadd.f32 %v67_v24, %v66_v22 }
  0x5b   :  { %v74_v27 = vadd.f32 %v73_v25, %v72_v23 }
  0x5c   :  { %v69_v28 = vrot.slane %v68_v26, 1 }
  0x5d   :  { %v75_v29 = vrot.slane %v74_v27, 1 }
  0x5e   :  { %v70_v30 = vadd.f32 %v69_v28, %v68_v26 }
  0x5f   :  { %v76_v32 = vadd.f32 %v75_v29, %v74_v27 }
  0x60   :  { %178 = vlog2.f32 %v70_v30 }
  0x61   :  { %180 = vlog2.f32 %v76_v32 }
  0x6a   :  { %v179_v37 = vpop.eup %178 }
  0x6b   :  { %v181_v39 = vpop.eup %180  ;;  %v78_v40 = vmul.f32 0.6931472, %v179_v37 }
  0x6c   :  { %v80_v42 = vmul.f32 0.6931472, %v181_v39 }
  0x6d   :  { %v81_v44 = vsub.f32 %v59_v14, %v78_v40 }
  0x6e   :  { %v82_v45 = vsub.f32 %v60_v15, %v80_v42 }
  0x6f   :  { %v85_v46 = vadd.f32 %v84_v43, %v81_v44 }
  0x70   :  { %v86_v47 = vadd.f32 %v84_v43, %v82_v45 }
  0x71   :  { %v99_v48 = vsel %vm97_vm0, %v85_v46, 0.0 }
  0x72   :  { %v100_v49 = vsel %vm98_vm1, %v86_v47, 0.0  ;;  %v101_v50 = vrot.slane %v99_v48, 4 }
  0x73   :  { %v107_v51 = vrot.slane %v100_v49, 4 }
  0x74   :  { %v102_v52 = vadd.f32 %v101_v50, %v99_v48 }
  0x75   :  { %v108_v53 = vadd.f32 %v107_v51, %v100_v49 }
  0x76   :  { %v103_v54 = vrot.slane %v102_v52, 2 }
  0x77   :  { %v109_v55 = vrot.slane %v108_v53, 2 }
  0x78   :  { %v104_v58 = vadd.f32 %v103_v54, %v102_v52 }
  0x79   :  { %v110_v59 = vadd.f32 %v109_v55, %v108_v53 }
  0x7a   :  { %v105_v60 = vrot.slane %v104_v58, 1 }
  0x7b   :  { %v111_v61 = vrot.slane %v110_v59, 1 }
  0x7c   :  { %v106_v0 = vadd.f32 %v105_v60, %v104_v58 }
  0x7d   :  { %v112_v1 = vadd.f32 %v111_v61, %v110_v59 }
  0x7e   :  { %v122_v2 = vmul.f32 %v121_v62, %v106_v0 }
  0x7f   :  { %v123_v3 = vmul.f32 %v121_v62, %v112_v1 }
  0x81   :  { %v126_v5 = vcombine.low %v122_v2, %v123_v3 }
  0x83   :  { %v133_v6 = vrot.slane %v126_v5, %v132_v4 }
  0x85   :  { %v140_v7 = vrot.slane %v133_v6, %v132_v4 }
  0x87   :  { %146 = vst.msk [vmem:[#allocation10] sm:$0x3] %vm144_vm2, %v140_v7 }
  0x88   :  { %257 = shalt.err (!%p254_p12)
}
  0x89   :  { %s258_s16 = scalar_lea.hbm %s370_s4, 32 }
  0x8a   :  { %p259_p13 = scmp.ne.s32.totalorder %s370_s4, %s258_s16  ;;  %p262_p0 = scmp.lt.u32.totalorder %s258_s16, %s370_s4 }
  0x8c   :  { %p264_p1 = pnand %p262_p0, %p259_p13 }
  0x8e   :  { %267 = shalt.err (!%p264_p1)
}
  0x8f   :  { %156 = dma.vmem_to_hbm [thread:$0]  %s154_s12, 32, %s370_s4, [#allocation7]  }
  0x90   :  { %274 = dma.done.wait [#allocation7], 32  }
  0x91   :  { %275 = vsyncadd [#allocation7], 4294967264 }
  0x92   :  { %160 = vsyncpa [#allocation6], 1 }
  0x93   :  { %161 = vsyncpa [#allocation9], 1 }
  0x94   :  { %162 = vsyncpa [#allocation7], 1 }

</bundles_post_ra>
